<compile_context>
chip_gen: v7x
topology: tpu7x:2x2x1
jax: 0.10.0
libtpu: 0.0.40
codegen_flags: <defaults>
</compile_context>

<pallas_src>
import functools

import jax
import jax.numpy as jnp
from jax import lax
from jax.experimental import pallas as pl
from jax.experimental.pallas import tpu as pltpu


_DMA_RING_DEPTH = 8                       # outstanding row DMAs in the HBM path
_DEFAULT_VMEM_BUDGET = 4 * 1024 * 1024    # bytes; conservative across v5e/v6e/v7x


def _index_put_vmem_kernel(idx_ref, in_ref, val_ref, out_ref):
    """Small-N fast path: everything VMEM-resident, plain vector stores.

    idx_ref : SMEM int32 [M]     scatter indices (pre-normalized/clamped)
    in_ref  : VMEM f32   [N, C]  input (HBM buffer aliased with the output)
    val_ref : VMEM f32   [M, C]  rows to write
    out_ref : VMEM f32   [N, C]  output block
    """
    out_ref[...] = in_ref[...]            # untouched rows keep the input data
    m = val_ref.shape[0]

    def body(i, carry):
        j = idx_ref[i]
        out_ref[pl.ds(j, 1), :] = val_ref[pl.ds(i, 1), :]
        return carry

    # Stores execute in index order -> last-write-wins for duplicate indices.
    # Unroll capped so a large M does not bloat instruction memory.
    lax.fori_loop(0, m, body, 0, unroll=min(m, 8))


def _index_put_hbm_kernel(idx_ref, in_ref, val_ref, out_ref, sems):
    """Large-N path: HBM->HBM row DMAs into the aliased output, K-deep DMA ring.

    idx_ref : SMEM int32 [M]
    in_ref  : HBM  f32   [N, C]  aliased with out_ref; never read
    val_ref : HBM  f32   [M, C]  rows to write (no VMEM staging)
    out_ref : HBM  f32   [N, C]  same physical buffer as in_ref
    sems    : DMA semaphore ring [K]
    """
    del in_ref                            # aliased: output buffer already holds input
    m = idx_ref.shape[0]
    k = _DMA_RING_DEPTH

    def row_copy(i, j):
        return pltpu.make_async_copy(
            val_ref.at[pl.ds(i, 1), :],   # (1, C) row of value  (HBM)
            out_ref.at[pl.ds(j, 1), :],   # (1, C) row of output (HBM, aliased)
            sems.at[i % k],
        )

    def body(i, carry):
        j = idx_ref[i]                    # SMEM read hoisted ahead of the wait

        @pl.when(i >= k)
        def _():                          # retire the copy that used this slot
            row_copy(i - k, idx_ref[i - k]).wait()

        row_copy(i, j).start()            # up to K copies in flight
        return carry

    lax.fori_loop(0, m, body, 0, unroll=min(m, 4))

    def drain(i, carry):                  # retire the last <= K outstanding copies
        row_copy(i, idx_ref[i]).wait()
        return carry

    lax.fori_loop(max(m - k, 0), m, drain, 0)


@functools.partial(jax.jit, static_argnames=("vmem_budget_bytes",), donate_argnums=(0,))
def index_put_2d_nonaccumulate(inp, index, value, *,
                               vmem_budget_bytes=_DEFAULT_VMEM_BUDGET):
    """Equivalent of aten._index_put_impl_(input, (index,), value, accumulate=False)."""
    inp = inp.astype(jnp.float32)
    value = value.astype(jnp.float32)
    n, c = inp.shape
    m = index.shape[0]
    if m == 0:
        return inp

    # int64 index -> int32 (TPU scalar path is 32-bit); normalize negatives; clamp.
    # TODO(synk): PyTorch raises on out-of-range indices; we clamp instead because an
    # unchecked dynamic OOB DMA on TPU would silently corrupt memory or fault the chip.
    idx = index.astype(jnp.int32)
    idx = jnp.where(idx < 0, idx + n, idx)
    idx = jnp.clip(idx, 0, n - 1)

    # ---- Path A: VMEM-resident fast path for small problems -------------------
    vmem_bytes = 4 * (2 * n * c + m * c)            # input + output + value blocks
    if vmem_bytes <= vmem_budget_bytes:
        return pl.pallas_call(
            _index_put_vmem_kernel,
            out_shape=jax.ShapeDtypeStruct((n, c), jnp.float32),
            in_specs=[
                pl.BlockSpec(memory_space=pltpu.MemorySpace.SMEM),   # idx (scalars)
                pl.BlockSpec(memory_space=pltpu.MemorySpace.VMEM),   # input
                pl.BlockSpec(memory_space=pltpu.MemorySpace.VMEM),   # value
            ],
            out_specs=pl.BlockSpec(memory_space=pltpu.MemorySpace.VMEM),
            input_output_aliases={1: 0},                             # inp -> output
        )(idx, inp, value)

    # ---- Path B: HBM scatter with overlapped row DMAs --------------------------
    # Duplicates: remap every occurrence to the value row of its *last* occurrence so
    # all writes to the same row carry identical data; the K overlapped DMAs are then
    # order-independent and the result is deterministic (last-write-wins).
    if m > 1:
        order = jnp.arange(m, dtype=jnp.int32)
        last_writer = jnp.full((n,), -1, dtype=jnp.int32).at[idx].max(order)
        value = jnp.take(value, jnp.take(last_writer, idx), axis=0)

    # TODO(synk): on v7x (2 TensorCores) the row DMAs could also be split across cores
    # with a parallel grid for ~2x issue rate; kept single-core here for portability.
    return pl.pallas_call(
        _index_put_hbm_kernel,
        out_shape=jax.ShapeDtypeStruct((n, c), jnp.float32),
        in_specs=[
            pl.BlockSpec(memory_space=pltpu.MemorySpace.SMEM),       # idx (scalars)
            pl.BlockSpec(memory_space=pl.ANY),                       # input (HBM, aliased)
            pl.BlockSpec(memory_space=pl.ANY),                       # value (HBM)
        ],
        out_specs=pl.BlockSpec(memory_space=pl.ANY),                 # output = aliased input
        scratch_shapes=[pltpu.SemaphoreType.DMA((_DMA_RING_DEPTH,))],
        input_output_aliases={1: 0},                                 # inp -> output
    )(idx, inp, value)


if __name__ == "__main__":
    key = jax.random.PRNGKey(0)
    k1, k2, k3, k4, k5, k6 = jax.random.split(key, 6)

    # ---- Test 1: small shapes -> VMEM-resident fast path ----------------------
    N1, C1, M1 = 16, 128, 6
    inp1 = jax.random.normal(k1, (N1, C1), dtype=jnp.float32)
    idx1 = jax.random.randint(k2, (M1,), minval=0, maxval=N1, dtype=jnp.int32)
    idx1 = idx1.at[3].set(idx1[0])            # duplicate -> exercises last-write-wins
    val1 = jax.random.normal(k3, (M1, C1), dtype=jnp.float32)

    ref1 = inp1                                # reference BEFORE the call (inp1 is donated)
    for i in range(M1):
        ref1 = ref1.at[idx1[i], :].set(val1[i, :])

    out1 = jax.block_until_ready(index_put_2d_nonaccumulate(inp1, idx1, val1))
    assert jnp.array_equal(out1, ref1), "VMEM fast-path mismatch vs. reference"

    # ---- Test 2: force the HBM scatter path (pipelined row DMAs) ---------------
    N2, C2, M2 = 256, 128, 16
    inp2 = jax.random.normal(k4, (N2, C2), dtype=jnp.float32)
    idx2 = jax.random.randint(k5, (M2,), minval=0, maxval=N2, dtype=jnp.int32)
    idx2 = idx2.at[7].set(idx2[2])            # duplicate
    val2 = jax.random.normal(k6, (M2, C2), dtype=jnp.float32)

    ref2 = inp2
    for i in range(M2):
        ref2 = ref2.at[idx2[i], :].set(val2[i, :])

    out2 = jax.block_until_ready(
        index_put_2d_nonaccumulate(inp2, idx2, val2, vmem_budget_bytes=0))
    assert jnp.array_equal(out2, ref2), "HBM scatter-path mismatch vs. reference"

    print("KERNEL_OK")
</pallas_src>

<mosaic_0001>
module attributes {stable_mosaic.version = 11 : i64} {
  func.func @_index_put_vmem_kernel(%arg0: memref<6xi32, #tpu.memory_space<smem>>, %arg1: memref<16x128xf32, #tpu.memory_space<vmem>>, %arg2: memref<6x128xf32, #tpu.memory_space<vmem>>, %arg3: memref<16x128xf32, #tpu.memory_space<vmem>>) attributes {dimension_semantics = [], scalar_prefetch = 0 : i64, scratch_operands = 0 : i64, tpu.core_type = #tpu.core_type<tc>} {
    %c0 = arith.constant 0 : index
    %c0_0 = arith.constant 0 : index
    %0 = vector.load %arg1[%c0, %c0_0] : memref<16x128xf32, #tpu.memory_space<vmem>>, vector<16x128xf32>
    %c0_1 = arith.constant 0 : index
    %c0_2 = arith.constant 0 : index
    %1 = vector.load %arg3[%c0_1, %c0_2] : memref<16x128xf32, #tpu.memory_space<vmem>>, vector<16x128xf32>
    tpu.vector_store %arg3[%c0_1, %c0_2], %0 {strides = array<i32>} : memref<16x128xf32, #tpu.memory_space<vmem>>, vector<16x128xf32>,
    %c0_i32 = arith.constant 0 : i32
    %2 = arith.index_cast %c0_i32 : i32 to index
    %3 = memref.load %arg0[%2] : memref<6xi32, #tpu.memory_space<smem>>
    %4 = arith.index_cast %c0_i32 : i32 to index
    %c0_3 = arith.constant 0 : index
    %5 = vector.load %arg2[%4, %c0_3] : memref<6x128xf32, #tpu.memory_space<vmem>>, vector<1x128xf32>
    %6 = arith.index_cast %3 : i32 to index
    %c0_4 = arith.constant 0 : index
    %7 = vector.load %arg3[%6, %c0_4] : memref<16x128xf32, #tpu.memory_space<vmem>>, vector<1x128xf32>
    tpu.vector_store %arg3[%6, %c0_4], %5 {strides = array<i32>} : memref<16x128xf32, #tpu.memory_space<vmem>>, vector<1x128xf32>,
    %c1_i32 = arith.constant 1 : i32
    %8 = arith.index_cast %c1_i32 : i32 to index
    %9 = memref.load %arg0[%8] : memref<6xi32, #tpu.memory_space<smem>>
    %10 = arith.index_cast %c1_i32 : i32 to index
    %c0_5 = arith.constant 0 : index
    %11 = vector.load %arg2[%10, %c0_5] : memref<6x128xf32, #tpu.memory_space<vmem>>, vector<1x128xf32>
    %12 = arith.index_cast %9 : i32 to index
    %c0_6 = arith.constant 0 : index
    %13 = vector.load %arg3[%12, %c0_6] : memref<16x128xf32, #tpu.memory_space<vmem>>, vector<1x128xf32>
    tpu.vector_store %arg3[%12, %c0_6], %11 {strides = array<i32>} : memref<16x128xf32, #tpu.memory_space<vmem>>, vector<1x128xf32>,
    %c2_i32 = arith.constant 2 : i32
    %14 = arith.index_cast %c2_i32 : i32 to index
    %15 = memref.load %arg0[%14] : memref<6xi32, #tpu.memory_space<smem>>
    %16 = arith.index_cast %c2_i32 : i32 to index
    %c0_7 = arith.constant 0 : index
    %17 = vector.load %arg2[%16, %c0_7] : memref<6x128xf32, #tpu.memory_space<vmem>>, vector<1x128xf32>
    %18 = arith.index_cast %15 : i32 to index
    %c0_8 = arith.constant 0 : index
    %19 = vector.load %arg3[%18, %c0_8] : memref<16x128xf32, #tpu.memory_space<vmem>>, vector<1x128xf32>
    tpu.vector_store %arg3[%18, %c0_8], %17 {strides = array<i32>} : memref<16x128xf32, #tpu.memory_space<vmem>>, vector<1x128xf32>,
    %c3_i32 = arith.constant 3 : i32
    %20 = arith.index_cast %c3_i32 : i32 to index
    %21 = memref.load %arg0[%20] : memref<6xi32, #tpu.memory_space<smem>>
    %22 = arith.index_cast %c3_i32 : i32 to index
    %c0_9 = arith.constant 0 : index
    %23 = vector.load %arg2[%22, %c0_9] : memref<6x128xf32, #tpu.memory_space<vmem>>, vector<1x128xf32>
    %24 = arith.index_cast %21 : i32 to index
    %c0_10 = arith.constant 0 : index
    %25 = vector.load %arg3[%24, %c0_10] : memref<16x128xf32, #tpu.memory_space<vmem>>, vector<1x128xf32>
    tpu.vector_store %arg3[%24, %c0_10], %23 {strides = array<i32>} : memref<16x128xf32, #tpu.memory_space<vmem>>, vector<1x128xf32>,
    %c4_i32 = arith.constant 4 : i32
    %26 = arith.index_cast %c4_i32 : i32 to index
    %27 = memref.load %arg0[%26] : memref<6xi32, #tpu.memory_space<smem>>
    %28 = arith.index_cast %c4_i32 : i32 to index
    %c0_11 = arith.constant 0 : index
    %29 = vector.load %arg2[%28, %c0_11] : memref<6x128xf32, #tpu.memory_space<vmem>>, vector<1x128xf32>
    %30 = arith.index_cast %27 : i32 to index
    %c0_12 = arith.constant 0 : index
    %31 = vector.load %arg3[%30, %c0_12] : memref<16x128xf32, #tpu.memory_space<vmem>>, vector<1x128xf32>
    tpu.vector_store %arg3[%30, %c0_12], %29 {strides = array<i32>} : memref<16x128xf32, #tpu.memory_space<vmem>>, vector<1x128xf32>,
    %c5_i32 = arith.constant 5 : i32
    %32 = arith.index_cast %c5_i32 : i32 to index
    %33 = memref.load %arg0[%32] : memref<6xi32, #tpu.memory_space<smem>>
    %34 = arith.index_cast %c5_i32 : i32 to index
    %c0_13 = arith.constant 0 : index
    %35 = vector.load %arg2[%34, %c0_13] : memref<6x128xf32, #tpu.memory_space<vmem>>, vector<1x128xf32>
    %36 = arith.index_cast %33 : i32 to index
    %c0_14 = arith.constant 0 : index
    %37 = vector.load %arg3[%36, %c0_14] : memref<16x128xf32, #tpu.memory_space<vmem>>, vector<1x128xf32>
    tpu.vector_store %arg3[%36, %c0_14], %35 {strides = array<i32>} : memref<16x128xf32, #tpu.memory_space<vmem>>, vector<1x128xf32>,
    %c6_i32 = arith.constant 6 : i32
    return
  }
}

</mosaic_0001>

<bundles_post_ra>
// kernel: index_put_2d_nonaccumulate.1
= control target key start
LH: loop header
LB: loop body
LE: loop exit
PB: predicated region body
PF: predicated region fallthrough
CT: control target
= control target key end

     0   :  { %8 = vsyncpa [#allocation5], 0  ;;  %s242_s0 = inlined_call_operand.vmem [shape: s32[6], index: 0, kind: input, shape index: {}]   ;;  %s243_s1 = inlined_call_operand.hbm [shape: f32[16,128], index: 1, kind: input, shape index: {}, may-alias: {1,3}]   ;;  %s244_s2 = inlined_call_operand.vmem [shape: f32[6,128], index: 2, kind: input, shape index: {}]   ;;  %s245_s3 = inlined_call_operand.hbm [shape: f32[16,128], index: 3, kind: output, shape index: {}, may-alias: {1,3}]  }
   0x1   :  { %9 = vsyncpa [#allocation3], 0 }
   0x2   :  { %10 = vsyncpa [#allocation4], 0  ;;  %s17_s14 = sshll.u32 %s242_s0, 4  ;;  %s18_s14 = int_to_ptr.vmem [resolvable:$true] %s17_s14 }
   0x3   :  { %s104_s15 = scalar_lea.vmem %s18_s14, 16  ;;  %p109_p1 = scmp.lt.s32.totalorder %s18_s14, %s18_s14 }
   0x4   :  { %p105_p0 = scmp.ne.s32.totalorder %s18_s14, %s104_s15  ;;  %p110_p2 = scmp.lt.s32.totalorder %s104_s15, %s104_s15 }
   0x6   :  { %p111_p3 = por %p110_p2, %p109_p1 }
   0x8   :  { %p112_p4 = pnand %p111_p3, %p105_p0 }
   0xa   :  { %115 = shalt.err (!%p112_p4)
}
   0xb   :  { %s166_s16 = smov [#allocation2]   ;;  %s167_s17 = smov [#allocation6]  }
   0xc   :  { %20 = dma.vmem_to_smem %s18_s14, 16, %s166_s16, [#allocation5]  }
   0xd   :  { %s26_s18 = sshll.u32 %s167_s17, 4  ;;  %s116_s21 = scalar_lea.hbm %s243_s1, 256  ;;  %s27_s18 = int_to_ptr.vmem [resolvable:$true] %s26_s18 }
   0xe   :  { %p117_p5 = scmp.ne.s32.totalorder %s243_s1, %s116_s21  ;;  %p120_p6 = scmp.lt.u32.totalorder %s116_s21, %s243_s1 }
  0x10   :  { %p122_p7 = pnand %p120_p6, %p117_p5 }
  0x12   :  { %125 = shalt.err (!%p122_p7)
}
  0x13   :  { %s126_s25 = scalar_lea.vmem %s27_s18, 256  ;;  %p131_p9 = scmp.lt.s32.totalorder %s27_s18, %s27_s18 }
  0x14   :  { %p127_p8 = scmp.ne.s32.totalorder %s27_s18, %s126_s25  ;;  %p132_p10 = scmp.lt.s32.totalorder %s126_s25, %s126_s25 }
  0x16   :  { %p133_p11 = por %p132_p10, %p131_p9 }
  0x18   :  { %p134_p12 = pnand %p133_p11, %p127_p8 }
  0x1a   :  { %137 = shalt.err (!%p134_p12)
}
  0x1b   :  { %s168_s26 = smov 128   ;;  %s169_s27 = smov 8  }
  0x1c   :  { %32 = dma.hbm_to_vmem [thread:$0]  %s243_s1, 256, %s27_s18, [#allocation3], %s168_s26, %s168_s26, %s169_s27  }
  0x1d   :  { %160 = dma.done.wait [#allocation5], 16  }
  0x1e   :  { %161 = vsyncadd [#allocation5], 4294967280 }
  0x1f   :  { %162 = dma.done.wait [#allocation3], 256  }
  0x20   :  { %163 = vsyncadd [#allocation3], 4294967040 }
  0x21   :  { %41 = sfence }
  0x22   :  { %v42_v0 = vld [vmem:[#allocation6] sm:$0xff]  ;;  %v43_v1 = vld [vmem:[#allocation6 + $0x8] sm:$0xff]  ;;  %s46_s30 = sld [smem:[#allocation2]]  ;;  %s94_s4 = sld [smem:[#allocation2 + $0x1]] }
  0x23   :  { %44 = vst [vmem:[#allocation7] sm:$0xff] %v42_v0  ;;  %45 = vst [vmem:[#allocation7 + $0x8] sm:$0xff] %v43_v1  ;;  %s95_s5 = sld [smem:[#allocation2 + $0x2]]  ;;  %s96_s6 = sld [smem:[#allocation2 + $0x3]]  ;;  %v47_v2 = vld [vmem:[%s244_s2] sm:$0x1] }
  0x24   :  { %s97_s7 = sld [smem:[#allocation2 + $0x4]]  ;;  %s98_s8 = sld [smem:[#allocation2 + $0x5]]  ;;  %v51_v3 = vld [vmem:[%s244_s2 + $0x1] sm:$0x1]  ;;  %v55_v4 = vld [vmem:[%s244_s2 + $0x2] sm:$0x1] }
  0x25   :  { %s170_s14 = smov [#allocation7]   ;;  %v59_v5 = vld [vmem:[%s244_s2 + $0x3] sm:$0x1]  ;;  %v63_v6 = vld [vmem:[%s244_s2 + $0x4] sm:$0x1] }
  0x26   :  { %s75_s15 = sshll.u32 %s170_s14, 4  ;;  %v67_v7 = vld [vmem:[%s244_s2 + $0x5] sm:$0x1]  ;;  %s76_s15 = int_to_ptr.vmem [resolvable:$true] %s75_s15 }
  0x27   :  { %s138_s29 = scalar_lea.vmem %s76_s15, 256  ;;  %p143_p0 = scmp.lt.s32.totalorder %s76_s15, %s76_s15 }
  0x28   :  { %s48_s16 = scalar_lea.vmem [#allocation7], %s46_s30  ;;  %s52_s19 = scalar_lea.vmem [#allocation7], %s94_s4 }
  0x29   :  { %49 = vst [vmem:[%s48_s16] sm:$0x1] %v47_v2  ;;  %s56_s22 = scalar_lea.vmem [#allocation7], %s95_s5  ;;  %s60_s24 = scalar_lea.vmem [#allocation7], %s96_s6 }
  0x2a   :  { %53 = vst [vmem:[%s52_s19] sm:$0x1] %v51_v3  ;;  %s64_s25 = scalar_lea.vmem [#allocation7], %s97_s7  ;;  %s68_s28 = scalar_lea.vmem [#allocation7], %s98_s8 }
  0x2b   :  { %57 = vst [vmem:[%s56_s22] sm:$0x1] %v55_v4  ;;  %p139_p13 = scmp.ne.s32.totalorder %s76_s15, %s138_s29  ;;  %p144_p1 = scmp.lt.s32.totalorder %s138_s29, %s138_s29 }
  0x2c   :  { %61 = vst [vmem:[%s60_s24] sm:$0x1] %v59_v5 }
  0x2d   :  { %65 = vst [vmem:[%s64_s25] sm:$0x1] %v63_v6  ;;  %p145_p2 = por %p144_p1, %p143_p0 }
  0x2e   :  { %69 = vst [vmem:[%s68_s28] sm:$0x1] %v67_v7 }
  0x2f   :  { %p146_p3 = pnand %p145_p2, %p139_p13 }
  0x31   :  { %149 = shalt.err (!%p146_p3)
}
  0x32   :  { %s150_s5 = scalar_lea.hbm %s245_s3, 256 }
  0x33   :  { %p151_p4 = scmp.ne.s32.totalorder %s245_s3, %s150_s5  ;;  %p154_p5 = scmp.lt.u32.totalorder %s150_s5, %s245_s3 }
  0x35   :  { %p156_p6 = pnand %p154_p5, %p151_p4 }
  0x37   :  { %159 = shalt.err (!%p156_p6)
}
  0x38   :  { %81 = dma.vmem_to_hbm [thread:$0]  %s76_s15, 256, %s245_s3, [#allocation4], %s168_s26, %s168_s26, %s169_s27  }
  0x39   :  { %164 = dma.done.wait [#allocation4], 256  }
  0x3a   :  { %165 = vsyncadd [#allocation4], 4294967040 }
  0x3b   :  { %85 = vsyncpa [#allocation3], 1 }
  0x3c   :  { %86 = vsyncpa [#allocation4], 1 }
  0x3d   :  { %87 = vsyncpa [#allocation5], 1 }

</bundles_post_ra>
